<compile_context>
chip_gen: v7x
topology: tpu7x:2x2x1
jax: 0.10.0
libtpu: 0.0.40
codegen_flags: <defaults>
</compile_context>

<pallas_src>
import jax
import jax.numpy as jnp
from jax.experimental import pallas as pl
from jax.experimental.pallas import tpu as pltpu


_MIN_GRID_STEPS = 8  # keep both v7x TensorCores + the pipeline busy


# --------------------------------------------------------------------------
# Sizing helpers
# --------------------------------------------------------------------------
def _vmem_capacity_bytes() -> int:
    try:
        cap = int(pltpu.get_tpu_info().vmem_capacity_bytes)
        if cap > 0:
            return cap
    except Exception:
        pass
    return 64 * 1024 * 1024  # conservative (v7x-sized) fallback


def _tile_cap(itemsize: int, vmem_bytes: int) -> int:
    """Largest power-of-two tile edge s.t. ~6 live (tile x tile) buffers
    (double-buffered in + out, plus headroom) fit in half of VMEM.
    -> 1024 for f32 on 64/128 MiB VMEM, 2048 for bf16 on 128 MiB."""
    budget = vmem_bytes // 2
    t = 2048
    while t > 128 and 6 * t * t * itemsize > budget:
        t //= 2
    return t


def _vmem_limit(tile_bytes: int, vmem_bytes: int) -> int:
    want = 6 * tile_bytes + (4 << 20)
    return int(min(max(want, 16 << 20), (vmem_bytes * 4) // 5))


def _boost_steps(tiles, dims, batch, target=_MIN_GRID_STEPS):
    """Halve tiles (keeping them multiples of 128) until the grid has enough
    steps to shard across both v7x TensorCores and hide DMA latency."""
    tiles = list(tiles)

    def steps():
        s = batch
        for t, d in zip(tiles, dims):
            s *= pl.cdiv(d, t)
        return s

    while steps() < target:
        cands = [i for i, t in enumerate(tiles) if t % 256 == 0]
        if not cands:
            break
        i = max(cands, key=lambda j: tiles[j])
        tiles[i] //= 2
    return tuple(tiles)


# --------------------------------------------------------------------------
# Permutation reduction: collapse runs of axes that stay contiguous-in-order
# --------------------------------------------------------------------------
def _collapse(shape, p):
    m = len(p)
    groups = []
    cur = [p[0]]
    for j in range(1, m):
        if p[j] == p[j - 1] + 1:
            cur.append(p[j])
        else:
            groups.append(cur)
            cur = [p[j]]
    groups.append(cur)
    order = sorted(range(len(groups)), key=lambda g: groups[g][0])
    in_shape_c = []
    group_pos = {}
    for new_ax, g in enumerate(order):
        size = 1
        for a in groups[g]:
            size *= shape[a]
        in_shape_c.append(size)
        group_pos[g] = new_ax
    perm_c = tuple(group_pos[g] for g in range(len(groups)))
    return tuple(in_shape_c), perm_c


# --------------------------------------------------------------------------
# Fast path: batched 2-D transpose  (B, M, N) -> (B, N, M)
# --------------------------------------------------------------------------
def _t2d_kernel(x_ref, o_ref):
    # (t_m, t_n) -> (t_n, t_m): pure XLU transpose.
    o_ref[...] = x_ref[...].T


def _transpose_tiled(x3, vmem_cap):
    """Config A: both minor dims >= 128 (or fallback) -> 2-D tiled transpose,
    fixed tiles + cdiv grid, edge blocks masked."""
    B, M, N = x3.shape
    itemsize = jnp.dtype(x3.dtype).itemsize
    cap = _tile_cap(itemsize, vmem_cap)
    t_m = M if M <= cap else cap
    t_n = N if N <= cap else cap
    t_n, t_m = _boost_steps((t_n, t_m), (N, M), B)
    grid = (B, pl.cdiv(N, t_n), pl.cdiv(M, t_m))
    tile_bytes = t_m * t_n * itemsize
    return pl.pallas_call(
        _t2d_kernel,
        out_shape=jax.ShapeDtypeStruct((B, N, M), x3.dtype),
        grid=grid,
        in_specs=[pl.BlockSpec((None, t_m, t_n), lambda b, jn, jm: (b, jm, jn))],
        out_specs=pl.BlockSpec((None, t_n, t_m), lambda b, jn, jm: (b, jn, jm)),
        compiler_params=pltpu.CompilerParams(
            dimension_semantics=("parallel", "parallel", "parallel"),
            vmem_limit_bytes=_vmem_limit(tile_bytes, vmem_cap)),
        cost_estimate=pl.CostEstimate(
            flops=0, transcendentals=0, bytes_accessed=2 * x3.size * itemsize),
    )(x3)


def _tflat_out_kernel(x_ref, o_ref):
    # x_ref: (B, M, t_n) -> o_ref: (B, t_n*M) lane-dense flattened rows.
    o_ref[...] = jnp.transpose(x_ref[...], (0, 2, 1)).reshape(o_ref.shape)


def _transpose_flat_out(x3, vmem_cap):
    """Config B: output minor dim M < 128 -> write a flattened (B, N*M) slab
    in multiple-of-128 blocks (unmasked full-width stores)."""
    B, M, N = x3.shape
    itemsize = jnp.dtype(x3.dtype).itemsize
    budget = max(vmem_cap // 16, 1 << 20)
    if N <= 128:
        t_n = N
    else:
        cap = max(128, (budget // (B * M * itemsize)) // 128 * 128)
        t_n = min(cap, max(128, (N // 128) * 128))
        (t_n,) = _boost_steps((t_n,), (N,), 1)
    grid = (pl.cdiv(N, t_n),)
    tile_bytes = B * M * t_n * itemsize
    out_flat = pl.pallas_call(
        _tflat_out_kernel,
        out_shape=jax.ShapeDtypeStruct((B, N * M), x3.dtype),
        grid=grid,
        in_specs=[pl.BlockSpec((B, M, t_n), lambda jn: (0, 0, jn))],
        out_specs=pl.BlockSpec((B, t_n * M), lambda jn: (0, jn)),
        compiler_params=pltpu.CompilerParams(
            dimension_semantics=("parallel",),
            vmem_limit_bytes=_vmem_limit(tile_bytes, vmem_cap)),
        cost_estimate=pl.CostEstimate(
            flops=0, transcendentals=0, bytes_accessed=2 * x3.size * itemsize),
    )(x3)
    return out_flat.reshape(B, N, M)


def _tflat_in_kernel(x_ref, o_ref):
    # x_ref: (B, t_m*N) flat input rows -> o_ref: (B, N, t_m) lane-dense output.
    Bk, Nk, t_m = o_ref.shape
    o_ref[...] = jnp.transpose(x_ref[...].reshape(Bk, t_m, Nk), (0, 2, 1))


def _transpose_flat_in(x3, vmem_cap):
    """Config C: input minor dim N < 128 (and M >= 128) -> read a flattened
    (B, M*N) slab in multiple-of-128 blocks; output stays lane-dense."""
    B, M, N = x3.shape
    itemsize = jnp.dtype(x3.dtype).itemsize
    budget = max(vmem_cap // 16, 1 << 20)
    cap = max(128, (budget // (B * N * itemsize)) // 128 * 128)
    t_m = min(cap, max(128, (M // 128) * 128))
    (t_m,) = _boost_steps((t_m,), (M,), 1)
    grid = (pl.cdiv(M, t_m),)
    tile_bytes = B * N * t_m * itemsize
    x_flat = x3.reshape(B, M * N)
    return pl.pallas_call(
        _tflat_in_kernel,
        out_shape=jax.ShapeDtypeStruct((B, N, M), x3.dtype),
        grid=grid,
        in_specs=[pl.BlockSpec((B, t_m * N), lambda jm: (0, jm))],
        out_specs=pl.BlockSpec((B, N, t_m), lambda jm: (0, 0, jm)),
        compiler_params=pltpu.CompilerParams(
            dimension_semantics=("parallel",),
            vmem_limit_bytes=_vmem_limit(tile_bytes, vmem_cap)),
        cost_estimate=pl.CostEstimate(
            flops=0, transcendentals=0, bytes_accessed=2 * x3.size * itemsize),
    )(x_flat)


def _batched_transpose(x3):
    B, M, N = x3.shape
    itemsize = jnp.dtype(x3.dtype).itemsize
    vmem_cap = _vmem_capacity_bytes()

    def whole_batch_fits(small_dim):
        return B * small_dim * 128 * itemsize <= vmem_cap // 8

    if M < 128 and whole_batch_fits(M):
        return _transpose_flat_out(x3, vmem_cap)
    if N < 128 and whole_batch_fits(N):
        return _transpose_flat_in(x3, vmem_cap)
    return _transpose_tiled(x3, vmem_cap)


# --------------------------------------------------------------------------
# General fallback: any (collapsed) permutation.
# --------------------------------------------------------------------------
def _permute_general(x, p):
    # TODO(synk): blocks span the last-two input + last-two output axes (so
    # both BlockSpecs stay full-extent on their minor dims); extremely large
    # minor-axis products could still exceed VMEM.
    m = x.ndim
    shape = x.shape
    out_shape = tuple(shape[a] for a in p)
    itemsize = jnp.dtype(x.dtype).itemsize
    vmem_cap = _vmem_capacity_bytes()

    full = sorted({m - 2, m - 1, p[-2], p[-1]})
    grid_axes = [a for a in range(m) if a not in full]
    grid = tuple(shape[a] for a in grid_axes) or (1,)
    gpos = {a: i for i, a in enumerate(grid_axes)}

    def in_index(*g):
        return tuple(0 if a in full else g[gpos[a]] for a in range(m))

    def out_index(*g):
        return tuple(0 if p[j] in full else g[gpos[p[j]]] for j in range(m))

    in_block = tuple(shape[a] if a in full else None for a in range(m))
    out_block = tuple(out_shape[j] if p[j] in full else None for j in range(m))

    q = [p[j] for j in range(m) if p[j] in full]      # output-ref axes (input ids)
    kperm = tuple(full.index(a) for a in q)           # input-ref -> output-ref

    def kernel(x_ref, o_ref):
        o_ref[...] = jnp.transpose(x_ref[...], kperm)

    block_bytes = itemsize
    for a in full:
        block_bytes *= shape[a]

    return pl.pallas_call(
        kernel,
        out_shape=jax.ShapeDtypeStruct(out_shape, x.dtype),
        grid=grid,
        in_specs=[pl.BlockSpec(in_block, in_index)],
        out_specs=pl.BlockSpec(out_block, out_index),
        compiler_params=pltpu.CompilerParams(
            dimension_semantics=("parallel",) * len(grid),
            vmem_limit_bytes=_vmem_limit(block_bytes, vmem_cap)),
        cost_estimate=pl.CostEstimate(
            flops=0, transcendentals=0, bytes_accessed=2 * x.size * itemsize),
    )(x)


# --------------------------------------------------------------------------
# Public entry point (== Permute(p).forward)
# --------------------------------------------------------------------------
def permute(x, p=(0, 2, 3, 1)):
    p = tuple(int(a) for a in p)
    assert len(p) == x.ndim and sorted(p) == list(range(x.ndim)), p
    if p == tuple(range(x.ndim)):
        return x

    shape_c, perm_c = _collapse(x.shape, p)
    out_shape = tuple(x.shape[a] for a in p)
    xc = x.reshape(shape_c)                     # free reshape of contiguous input
    nc = len(perm_c)

    if nc == 2 and perm_c == (1, 0):            # plain 2-D transpose
        res = _batched_transpose(xc.reshape((1,) + shape_c))
        return res.reshape(out_shape)
    if nc == 3 and perm_c == (0, 2, 1):         # batched minor-two swap (NCHW<->NHWC)
        res = _batched_transpose(xc)
        return res.reshape(out_shape)
    return _permute_general(xc, perm_c).reshape(out_shape)


class Permute:
    """Mirror of the PyTorch module: Permute(p)(x) == x.permute(*p)."""

    def __init__(self, p):
        self.p = tuple(int(a) for a in p)

    def __call__(self, x):
        return permute(x, self.p)


if __name__ == "__main__":
    key = jax.random.PRNGKey(0)
    k0, k1, k2, k3 = jax.random.split(key, 4)

    # Primary: canonical NCHW -> NHWC use (small channels -> flattened-output
    # lane-dense path).
    x = jax.random.normal(k0, (2, 4, 16, 16), dtype=jnp.float32)
    p = (0, 2, 3, 1)
    out = jax.block_until_ready(Permute(p)(x))
    ref = jnp.transpose(x, p)
    assert out.shape == ref.shape and out.dtype == ref.dtype
    assert bool(jnp.array_equal(out, ref)), "NCHW->NHWC (small C) mismatch"

    # 128-aligned channels exercise the 2-D tiled-transpose path.
    x2 = jax.random.normal(k1, (2, 128, 16, 16), dtype=jnp.float32)
    out2 = jax.block_until_ready(permute(x2, (0, 2, 3, 1)))
    assert bool(jnp.array_equal(out2, jnp.transpose(x2, (0, 2, 3, 1)))), \
        "NCHW->NHWC (aligned C) mismatch"

    # NHWC -> NCHW (small C) exercises the flattened-input path.
    x3 = jax.random.normal(k2, (2, 16, 16, 4), dtype=jnp.float32)
    out3 = jax.block_until_ready(permute(x3, (0, 3, 1, 2)))
    assert bool(jnp.array_equal(out3, jnp.transpose(x3, (0, 3, 1, 2)))), \
        "NHWC->NCHW mismatch"

    # Non-collapsible permutation exercises the general fallback.
    x4 = jax.random.normal(k3, (2, 8, 16, 128), dtype=jnp.float32)
    out4 = jax.block_until_ready(permute(x4, (0, 2, 1, 3)))
    assert bool(jnp.array_equal(out4, jnp.transpose(x4, (0, 2, 1, 3)))), \
        "general permute mismatch"

    print("KERNEL_OK")
</pallas_src>

<mosaic_0001>
module attributes {stable_mosaic.version = 11 : i64} {
  func.func @_tflat_out_kernel(%arg0: i32, %arg1: memref<2x4x128xf32, #tpu.memory_space<vmem>>, %arg2: memref<2x512xf32, #tpu.memory_space<vmem>>) attributes {dimension_semantics = [#tpu.dimension_semantics<parallel>], iteration_bounds = array<i64: 2>, scalar_prefetch = 0 : i64, scratch_operands = 0 : i64, tpu.core_type = #tpu.core_type<tc>, window_params = [{transform_indices = @transform_0, window_bounds = array<i64: 2, 4, 128>}, {transform_indices = @transform_1, window_bounds = array<i64: 2, 512>}]} {
    %c0 = arith.constant 0 : index
    %c0_0 = arith.constant 0 : index
    %c0_1 = arith.constant 0 : index
    %0 = vector.load %arg1[%c0, %c0_0, %c0_1] : memref<2x4x128xf32, #tpu.memory_space<vmem>>, vector<2x4x128xf32>
    %1 = tpu.transpose %0, [0, 2, 1] : vector<2x4x128xf32> -> vector<2x128x4xf32>
    %2 = vector.shape_cast %1 : vector<2x128x4xf32> to vector<2x512xf32>
    %c0_2 = arith.constant 0 : index
    %c0_3 = arith.constant 0 : index
    %3 = vector.load %arg2[%c0_2, %c0_3] : memref<2x512xf32, #tpu.memory_space<vmem>>, vector<2x512xf32>
    tpu.vector_store %arg2[%c0_2, %c0_3], %2 {strides = array<i32>} : memref<2x512xf32, #tpu.memory_space<vmem>>, vector<2x512xf32>,
    return
  }
  func.func @transform_0(%arg0: i32) -> (i32, i32, i32) {
    %c0_i32 = arith.constant 0 : i32
    %c0_i32_0 = arith.constant 0 : i32
    %c0_i32_1 = arith.constant 0 : i32
    return %c0_i32, %c0_i32_0, %arg0 : i32, i32, i32
  }
  func.func @transform_1(%arg0: i32) -> (i32, i32) {
    %c0_i32 = arith.constant 0 : i32
    %c0_i32_0 = arith.constant 0 : i32
    return %c0_i32, %arg0 : i32, i32
  }
}

</mosaic_0001>

<bundles_post_ra>
// kernel: tpu_custom_call.1
= control target key start
LH: loop header
LB: loop body
LE: loop exit
PB: predicated region body
PF: predicated region fallthrough
CT: control target
= control target key end

     0   :  { %6 = vsyncpa [#allocation3], 0  ;;  %s3342_s0 = inlined_call_operand.hbm [shape: f32[2,4,256], index: 0, kind: input, shape index: {}]   ;;  %s3343_s1 = inlined_call_operand.hbm [shape: f32[2,1024], index: 1, kind: output, shape index: {}]  }
   0x1   :  { %8 = vsyncpa [#allocation3 + $0x1], 0 }
   0x2   :  { %9 = vsyncpa [#allocation4], 0 }
   0x3   :  { %11 = vsyncpa [#allocation4 + $0x1], 0  ;;  %s2260_s6 = smov 0   ;;  %s2262_s7 = smov 0  }
   0x4   :  { %s2264_s8 = smov 0   ;;  %s2266_s9 = smov 0  }
   0x5 LB: > { %s2281_s10 = sadd.s32 4294967295, %s2209_s9   ;;  %s2016_s11 = sadd.s32 4294967294, %s2209_s9   ;;  %s2209_s9 = sphi %s2266_s9, %s3488_s9   ;;  %s2205_s8 = sphi %s2264_s8, %s3487_s8   ;;  %s2201_s7 = sphi %s2262_s7, %s3486_s7   ;;  %s2197_s6 = sphi %s2260_s6, %s3485_s6  }
   0x6   : > { %s2285_s12 = sadd.s32 1, %s2209_s9   ;;  %s24_s13 = sadd.s32 1, %s2205_s8 }
   0x7   : > { %s21_s14 = ssub.s32 %s2209_s9, %s2285_s12  ;;  %p31_p0 = scmp.ne.s32.totalorder %s2205_s8, %s2201_s7 }
   0x8   : > { %p22_p1 = scmp.eq.s32.totalorder %s21_s14, 0  ;;  %p32_p2 = scmp.eq.s32.totalorder %s2209_s9, 0 }
   0x9   : > { %p37_p3 = scmp.ne.s32.totalorder %s2201_s7, %s2197_s6  ;;  %p38_p4 = scmp.eq.s32.totalorder %s2281_s10, 0 }
   0xa   : > { %s2297_s15 = scalar_select %p22_p1, %s2205_s8, %s24_s13  }
   0xb   : > { %p2299_p5 = por %p32_p2, %p31_p0  ;;  %p2303_p6 = por %p38_p4, %p37_p3 }
   0xc   : > { %p61_p7 = scmp.eq.s32.totalorder %s2281_s10, 1  ;;  %p67_p8 = scmp.eq.s32.totalorder %s2016_s11, 1 }
   0xd   : > { %p2042_p10 = scmp.lt.s32.totalorder %s2209_s9, 2  ;;  %s87_s20 = sand.u32 1, %s2205_s8  }
   0xe   : > { %p2310_p11 = por %p61_p7, %p31_p0  ;;  %p2314_p12 = por %p67_p8, %p37_p3 }
   0xf   : > { %s2020_s21 = sshll.u32 %s2209_s9, 6  ;;  %s2019_s22 = sshll.u32 %s87_s20, 3 }
  0x10   : > { %s3407_s18 = scalar_select %p2310_p11, 1, 0 }
  0x11   : > { %s3408_s19 = scalar_select %p2314_p12, 1, 0 }
  0x12   : > { %s2323_s25 = scalar_lea.hbm %s3342_s0, %s2020_s21  ;;  %s91_s26 = scalar_lea.vmem [#allocation2], %s2019_s22 }
  0x13   : > { %s97_s27 = sshll.u32 %s91_s26, 4  ;;  %p2327_p13 = pnand %p2042_p10, %p2299_p5  ;;  %s2331_s27 = int_to_ptr.vmem [resolvable:$true] %s97_s27 }
  0x14   : > { %s2334_s29 = scalar_lea.sflag [#allocation3], %s87_s20  ;;  %s2113_s30 = scalar_lea.hbm %s2323_s25, 128 }
  0x15   : > { %p2114_p1 = scmp.ne.s32.totalorder %s2323_s25, %s2113_s30  ;;  %p2115_p2 = pneg %p2327_p13 }
  0x16   : > { %s2118_s4 = scalar_lea.hbm %s3342_s0, 256  ;;  %p2119_p5 = scmp.lt.u32.totalorder %s2323_s25, %s3342_s0 }
  0x17   : > { %p2116_p3 = pnand %p2115_p2, %p2114_p1  ;;  %p2120_p7 = scmp.lt.u32.totalorder %s2118_s4, %s2113_s30 }
  0x18   : > { %p2122_p10 = scmp.lt.u32.totalorder %s2113_s30, %s2323_s25 }
  0x19   : > { %p2117_p4 = pneg %p2116_p3  ;;  %p2121_p8 = por %p2120_p7, %p2119_p5 }
  0x1b   : > { %p2123_p9 = por %p2122_p10, %p2121_p8 }
  0x1d   : > { %p2124_p0 = pnand %p2123_p9, %p2117_p4 }
  0x1f   : > { %2127 = shalt.err (!%p2124_p0)
}
  0x20   : > { %s2128_s13 = scalar_lea.vmem %s2331_s27, 128  ;;  %s2211_s14 = smov [#allocation2]  }
  0x21   : > { %p2129_p1 = scmp.ne.s32.totalorder %s2331_s27, %s2128_s13  ;;  %s2133_s16 = sshll.u32 %s2211_s14, 4  ;;  %s2134_s16 = int_to_ptr.vmem [resolvable:$false] %s2133_s16 }
  0x22   : > { %s2135_s20 = scalar_lea.vmem %s2134_s16, 256  ;;  %p2136_p11 = scmp.lt.s32.totalorder %s2331_s27, %s2134_s16 }
  0x23   : > { %p2131_p3 = pnand %p2129_p1, %p2115_p2  ;;  %p2137_p5 = scmp.lt.s32.totalorder %s2135_s20, %s2128_s13 }
  0x25   : > { %p2132_p12 = pneg %p2131_p3  ;;  %p2138_p7 = por %p2137_p5, %p2136_p11 }
  0x27   : > { %p2139_p8 = pnand %p2138_p7, %p2132_p12 }
  0x29   : > { %2142 = shalt.err (!%p2139_p8)
}
  0x2a   : > { %s2212_s21 = smov 128   ;;  %s2213_s22 = smov 64  }
  0x2b   : > { %s2214_s23 = smov 4   ;;  %p105_p9 = scmp.lt.s32.totalorder %s2209_s9, 3 }
  0x2c   : > { %2037 = dma.hbm_to_vmem [thread:$0]  (!%p2327_p13), %s2323_s25, 128, %s2331_s27, %s2334_s29, %s2212_s21, %s2213_s22, %s2214_s23  }
  0x2d   : > { %p3410_p0 = scmp.ge.s32.totalorder %s2209_s9, 1 }
  0x2f   : > { %p106_p2 = pnand %p3410_p0, %p105_p9 }
  0x31   : > { %109 = sbr.rel (%p106_p2) target bundleno = 720 (0x2d0), region = 24 }
  0x38   : > { %s2366_s24 = sand.u32 1, %s2201_s7  }
  0x39   : > { %s3345_s26 = sshll.u32 %s2366_s24, 3  ;;  %s112_s30 = scalar_lea.sflag [#allocation3], %s2366_s24 }
  0x3a   : > { %s115_s2 = scalar_lea.vmem [#allocation2], %s3345_s26 }
  0x3b   : > { %2188 = dma.done.wait (%p2303_p6), %s112_s30, 128  }
  0x3c   : > { %2190 = vsyncadd (%p2303_p6), %s112_s30, 4294967168  ;;  %v135_v0 = vld [vmem:[%s115_s2] sm:$0xf]  ;;  %v136_v1 = vld [vmem:[%s115_s2 + $0x4] sm:$0xf]  ;;  %v205_v18 = vlaneseq  ;;  %v2217_v34 = vmov 0.0  }
  0x3d   : > { %137 = vxpose.xlu0.b32.start.end [1/1] (short) %v135_v0, 128  ;;  %v2215_v16 = vmov 1983009808   ;;  %v2216_v22 = vmov 1934713408   ;;  %s2218_s17 = smov 8   ;;  %s3373_s25 = smov 4  }
  0x3e   : > { %v203_v17 = vunpack.c.l.s4 %v2215_v16  ;;  %v206_v21 = vshrl.u32 %v205_v18, 7  ;;  %v234_v23 = vunpack.c.l.s4 %v2216_v22  ;;  %s3371_s27 = smov 12   ;;  %s3356_s28 = smov 72   ;;  %vm1753_vm0 = vcmask 31744  }
  0x3f   : > { %s2222_s29 = smov 16   ;;  %s2223_s3 = smov 24   ;;  %vm1755_vm1 = vcmask 64512   ;;  %vm1757_vm2 = vcmask 97280   ;;  %vm1759_vm3 = vcmask 130048   ;;  %vm1761_vm4 = vcmask 162816  }
  0x40   : > { %v204_v20 = vunpack.c.0.s8 %v203_v17  ;;  %v235_v26 = vunpack.c.0.s8 %v234_v23  ;;  %s3354_s4 = smov 20   ;;  %s3350_s5 = smov 28   ;;  %vm1763_vm5 = vcmask 195584   ;;  %vm1765_vm6 = vcmask 228352  }
  0x41   : > { %s3352_s11 = smov 52   ;;  %s2227_s13 = smov 32   ;;  %vm3387_vm7 = vcmask 261120   ;;  %vm3386_vm8 = vcmask 293888   ;;  %vm1771_vm9 = vcmask 326656   ;;  %vm1773_vm10 = vcmask 359424  }
  0x42   : > { %v2406_v25 = vsub.s32 %v204_v20, %v206_v21  ;;  %v2410_v30 = vsub.s32 %v235_v26, %v206_v21  ;;  %s3370_s14 = smov 60   ;;  %s2229_s16 = smov 40   ;;  %vm3388_vm11 = vcmask 392192   ;;  %vm3389_vm12 = vcmask 424960  }
  0x43   : > { %s3358_s20 = smov 68   ;;  %s3348_s21 = smov 36   ;;  %vm3390_vm13 = vcmask 457728   ;;  %vm3391_vm14 = vcmask 490496   ;;  %vm3393_vm15 = vcmask 523264  }
  0x44   : > { %3411 = vst [vmem:[#allocation8_spill] sm:$0xff] %v2406_v25  ;;  %s3360_s22 = smov 76   ;;  %s3346_s23 = smov 44  }
  0x45   : > { %s3375_s30 = smov 84   ;;  %s2235_s2 = smov 48  }
  0x46   : > { %s3364_s26 = smov 92   ;;  %p3482_p11 = scmp.ne.s32.totalorder %s3407_s18, 0 }
  0x7a   : > { %169 = vxpose.xlu0.b32.start.end [1/1] (short) %v136_v1, 128 }
  0xbd   : > { %v153_v2 = vpop.trf.xlu0 }
  0xbe   : > { %v208_v28 = vrot.slane %v153_v2, %v2406_v25  ;;  %v201_v38 = vcombine.high %v153_v2, %v2217_v34 }
  0xc0   : > { %v215_v44 = vrot.slane %v201_v38, %v2406_v25 }
  0xc1   : > { %v2376_v3 = vpop.trf.xlu0 }
  0xc2   : > { %v274_v1 = vrot.slane %v2376_v3, %v2406_v25 }
  0xc5   : > { %v2378_v4 = vpop.trf.xlu0 }
  0xc6   : > { %v2425_v40 = vrot.slane %v2378_v4, %v2406_v25 }
  0xc9   : > { %v2380_v5 = vpop.trf.xlu0 }
  0xcd   : > { %v2382_v6 = vpop.trf.xlu0 }
  0xd1   : > { %v2384_v7 = vpop.trf.xlu0 }
  0xd2   : > { %v531_v53 = vcombine.high %v2384_v7, %v2217_v34 }
  0xd4   : > { %v545_v57 = vrot.slane %v531_v53, %v2406_v25 }
  0xd5   : > { %v2386_v8 = vpop.trf.xlu0 }
  0xd6   : > { %v604_v16 = vrot.slane %v2386_v8, %v2406_v25 }
  0xd9   : > { %v2388_v9 = vpop.trf.xlu0 }
  0xdd   : > { %v2390_v10 = vpop.trf.xlu0 }
  0xe1   : > { %v2392_v11 = vpop.trf.xlu0 }
  0xe5   : > { %v2394_v12 = vpop.trf.xlu0 }
  0xe9   : > { %v2396_v13 = vpop.trf.xlu0 }
  0xed   : > { %v2398_v14 = vpop.trf.xlu0 }
  0xf1   : > { %v2400_v15 = vpop.trf.xlu0 }
  0xf5   : > { %v2402_v19 = vpop.trf.xlu0 }
  0xf9   : > { %v2404_v24 = vpop.trf.xlu0 }
  0xfd   : > { %v185_v27 = vpop.trf.xlu0 }
  0xfe   : > { %v223_v29 = vrot.slane %v185_v27, %v2406_v25  ;;  %v216_v35 = vcombine.high %v185_v27, %v2217_v34  ;;  %v597_v27 = vcombine.high %v2386_v8, %v2217_v34 }
 0x100   : > { %v231_v31 = vcombine.low %v208_v28, %v223_v29  ;;  %v232_v32 = vcombine.high %v208_v28, %v223_v29  ;;  %v230_v41 = vrot.slane %v216_v35, %v2406_v25  ;;  %v2485_v28 = vrot.slane %v2390_v10, %v2406_v25 }
 0x101   : > { %v2412_v33 = vpop.trf.xlu0 }
 0x102   : > { %v246_v36 = vrot.slane %v232_v32, %v2410_v30  ;;  %v2417_v37 = vrot.slane %v231_v31, %v2410_v30  ;;  %v247_v49 = vcombine.low %v215_v44, %v230_v41  ;;  %v248_v52 = vcombine.high %v215_v44, %v230_v41 }
 0x103   : > { %v289_v60 = vrot.slane %v2412_v33, %v2406_v25  ;;  %v282_v31 = vcombine.high %v2412_v33, %v2217_v34  ;;  %v267_v44 = vcombine.high %v2376_v3, %v2217_v34 }
 0x104   : > { %1262 = vrot.lane.b32.xlu1 %v246_v36, %s2218_s17  ;;  %v263_v43 = vcombine.high %v2417_v37, %v2217_v34  ;;  %v264_v47 = vcombine.high %v246_v36, %v2217_v34  ;;  %v255_v51 = vrot.slane %v247_v49, %v2410_v30  ;;  %v262_v56 = vrot.slane %v248_v52, %v2410_v30 }
 0x105   : > { %v2421_v39 = vpop.trf.xlu0  ;;  %v297_v18 = vcombine.low %v274_v1, %v289_v60  ;;  %v298_v32 = vcombine.high %v274_v1, %v289_v60  ;;  %v861_v49 = vcombine.high %v2394_v12, %v2217_v34  ;;  %v2519_v52 = vrot.slane %v282_v31, %v2406_v25 }
 0x106   : > { %v2430_v42 = vrot.slane %v2421_v39, %v2406_v25  ;;  %v265_v62 = vcombine.high %v255_v51, %v2217_v34  ;;  %v266_v20 = vcombine.high %v262_v56, %v2217_v34  ;;  %v868_v60 = vrot.slane %v2394_v12, %v2406_v25 }
 0x107   : > { %v305_v36 = vrot.slane %v297_v18, %v2410_v30  ;;  %v312_v3 = vrot.slane %v298_v32, %v2410_v30  ;;  %v934_v12 = vrot.slane %v2396_v13, %v2406_v25 }
 0x108   : > { %v364_v45 = vcombine.high %v2425_v40, %v2430_v42  ;;  %1258 = vrot.lane.b32.xlu1 %v263_v43, %s3373_s25 }
 0x109   : > { %v2438_v46 = vpop.trf.xlu0  ;;  %v329_v18 = vcombine.high %v305_v36, %v2217_v34 }
 0x10a   : > { %v2442_v48 = vrot.slane %v364_v45, %v2410_v30  ;;  %v611_v45 = vrot.slane %v597_v27, %v2406_v25 }
 0x10c   : > { %1266 = vrot.lane.b32.xlu1 %v264_v47, %s3371_s27  ;;  %1326 = vrot.lane.b32.xlu0 %v2442_v48, %s3356_s28  ;;  %s3376_s28 = smov 124  }
 0x10d   : > { %v2447_v50 = vpop.trf.xlu0 }
 0x110   : > { %1270 = vrot.lane.b32.xlu1 %v255_v51, %s2222_s29 }
 0x111   : > { %v2453_v54 = vpop.trf.xlu0 }
 0x112   : > { %v546_v55 = vcombine.high %v2453_v54, %v2217_v34 }
 0x114   : > { %v560_v58 = vrot.slane %v546_v55, %v2406_v25  ;;  %1278 = vrot.lane.b32.xlu1 %v262_v56, %s2223_s3 }
 0x115   : > { %v191_v59 = vpop.trf.xlu0 }
 0x116   : > { %v577_v61 = vcombine.low %v545_v57, %v560_v58  ;;  %v578_v63 = vcombine.high %v545_v57, %v560_v58  ;;  %v619_v0 = vrot.slane %v191_v59, %v2406_v25  ;;  %v612_v21 = vcombine.high %v191_v59, %v2217_v34 }
 0x117   : > { %v2527_v57 = vrot.slane %v267_v44, %v2406_v25  ;;  %v2531_v58 = vcombine.high %v2388_v9, %v2217_v34  ;;  %v2535_v59 = vrot.slane %v2388_v9, %v2406_v25  ;;  %v875_v9 = vrot.slane %v861_v49, %v2406_v25 }
 0x118   : > { %1274 = vrot.lane.b32.xlu1 %v265_v62, %s3354_s4  ;;  %v2469_v2 = vrot.slane %v577_v61, %v2410_v30  ;;  %v627_v22 = vcombine.low %v604_v16, %v619_v0  ;;  %v2478_v26 = vrot.slane %v578_v63, %v2410_v30  ;;  %v626_v8 = vrot.slane %v612_v21, %v2406_v25  ;;  %s2241_s4 = smov 64  }
 0x119   : > { %v192_v17 = vpop.trf.xlu0  ;;  %v628_v38 = vcombine.high %v604_v16, %v619_v0  ;;  %v927_v61 = vcombine.high %v2396_v13, %v2217_v34  ;;  %v2578_v49 = vrot.slane %v2398_v14, %v2406_v25 }
 0x11a   : > { %v595_v23 = vcombine.high %v2469_v2, %v2217_v34  ;;  %v596_v41 = vcombine.high %v2478_v26, %v2217_v34  ;;  %v2501_v43 = vrot.slane %v627_v22, %v2410_v30  ;;  %v643_v53 = vcombine.low %v611_v45, %v626_v8 }
 0x11b   : > { %v2524_v56 = vrot.slane %v628_v38, %v2410_v30  ;;  %v644_v62 = vcombine.high %v611_v45, %v626_v8  ;;  %v2543_v63 = vrot.slane %v192_v17, %v2406_v25  ;;  %v313_v22 = vcombine.low %v2527_v57, %v2519_v52 }
 0x11c   : > { %1282 = vrot.lane.b32.xlu1 %v266_v20, %s3350_s5  ;;  %1430 = vrot.lane.b32.xlu0 %v595_v23, %s3352_s11  ;;  %v659_v55 = vcombine.high %v2501_v43, %v2217_v34  ;;  %v2555_v21 = vrot.slane %v643_v53, %v2410_v30  ;;  %v678_v23 = vcombine.high %v192_v17, %v2217_v34  ;;  %s3379_s5 = smov 108  }
 0x11d   : > { %v2488_v29 = vpop.trf.xlu0  ;;  %v660_v20 = vcombine.high %v2524_v56, %v2217_v34  ;;  %v941_v13 = vrot.slane %v927_v61, %v2406_v25  ;;  %v330_v38 = vcombine.high %v312_v3, %v2217_v34  ;;  %v2568_v17 = vrot.slane %v644_v62, %v2410_v30 }
 0x11e   : > { %v2494_v35 = vrot.slane %v2488_v29, %v2406_v25  ;;  %v321_v61 = vrot.slane %v313_v22, %v2410_v30  ;;  %v314_v62 = vcombine.high %v2527_v57, %v2519_v52 }
 0x11f   : > { %v662_v52 = vcombine.high %v2568_v17, %v2217_v34 }
 0x120   : > { %v759_v33 = vcombine.low %v2485_v28, %v2494_v35  ;;  %1286 = vrot.lane.b32.xlu1 %v305_v36, %s2227_s13  ;;  %1438 = vrot.lane.b32.xlu0 %v596_v41, %s3370_s14  ;;  %v693_v36 = vcombine.low %v2535_v59, %v2543_v63 }
 0x121   : > { %v2510_v47 = vpop.trf.xlu0 }
 0x122   : > { %v2515_v51 = vrot.slane %v759_v33, %v2410_v30  ;;  %v2605_v57 = vrot.slane %v693_v36, %v2410_v30 }
 0x124   : > { %3412 = vst [vmem:[#allocation9_spill] sm:$0xff] %v2515_v51  ;;  %1294 = vrot.lane.b32.xlu1 %v312_v3, %s2229_s16  ;;  %1446 = vrot.lane.b32.xlu0 %v659_v55, %s3358_s20  ;;  %v661_v3 = vcombine.high %v2555_v21, %v2217_v34 }
 0x125   : > { %v195_v0 = vpop.trf.xlu0 }
 0x126   : > { %v876_v1 = vcombine.high %v195_v0, %v2217_v34  ;;  %v883_v16 = vrot.slane %v195_v0, %v2406_v25 }
 0x128   : > { %v890_v27 = vrot.slane %v876_v1, %v2406_v25  ;;  %v891_v31 = vcombine.low %v868_v60, %v883_v16  ;;  %v892_v32 = vcombine.high %v868_v60, %v883_v16  ;;  %1290 = vrot.lane.b32.xlu1 %v329_v18, %s3348_s21  ;;  %1454 = vrot.lane.b32.xlu0 %v660_v20, %s3360_s22  ;;  %s2238_s21 = smov 100  }
 0x129   : > { %v196_v8 = vpop.trf.xlu0  ;;  %v692_v60 = vrot.slane %v678_v23, %v2406_v25 }
 0x12a   : > { %v2571_v41 = vrot.slane %v891_v31, %v2410_v30  ;;  %v2574_v44 = vrot.slane %v892_v32, %v2410_v30  ;;  %v907_v33 = vcombine.low %v875_v9, %v890_v27  ;;  %v908_v45 = vcombine.high %v875_v9, %v890_v27 }
 0x12b   : > { %v942_v53 = vcombine.high %v196_v8, %v2217_v34  ;;  %v949_v55 = vrot.slane %v196_v8, %v2406_v25  ;;  %v694_v9 = vcombine.high %v2535_v59, %v2543_v63  ;;  %v677_v32 = vrot.slane %v2531_v58, %v2406_v25 }
 0x12c   : > { %1298 = vrot.lane.b32.xlu1 %v330_v38, %s3346_s23  ;;  %v2590_v0 = vrot.slane %v907_v33, %v2410_v30  ;;  %1462 = vrot.lane.b32.xlu0 %v661_v3, %s3375_s30  ;;  %v2608_v59 = vrot.slane %v908_v45, %v2410_v30  ;;  %v725_v33 = vcombine.high %v2605_v57, %v2217_v34  ;;  %s2237_s23 = smov 56  }
 0x12d   : > { %v956_v1 = vrot.slane %v942_v53, %v2406_v25  ;;  %v957_v16 = vcombine.low %v934_v12, %v949_v55  ;;  %v958_v18 = vcombine.high %v934_v12, %v949_v55  ;;  %v2596_v20 = vpop.trf.xlu0  ;;  %v709_v38 = vcombine.low %v677_v32, %v692_v60 }
 0x12e   : > { %v2600_v22 = vrot.slane %v2596_v20, %v2406_v25  ;;  %v2632_v45 = vrot.slane %v694_v9, %v2410_v30  ;;  %v331_v53 = vcombine.high %v321_v61, %v2217_v34  ;;  %v710_v55 = vcombine.high %v677_v32, %v692_v60 }
 0x12f   : > { %v2611_v63 = vrot.slane %v957_v16, %v2410_v30  ;;  %v2614_v12 = vrot.slane %v958_v18, %v2410_v30  ;;  %v973_v23 = vcombine.low %v941_v13, %v956_v1  ;;  %v974_v27 = vcombine.high %v941_v13, %v956_v1 }
 0x130   : > { %v1023_v31 = vcombine.low %v2578_v49, %v2600_v22  ;;  %1302 = vrot.lane.b32.xlu1 %v321_v61, %s2235_s2  ;;  %1470 = vrot.lane.b32.xlu0 %v662_v52, %s3364_s26  ;;  %v328_v13 = vrot.slane %v314_v62, %v2410_v30  ;;  %v726_v3 = vcombine.high %v2632_v45, %v2217_v34 }
 0x131   : > { %v2623_v36 = vrot.slane %v973_v23, %v2410_v30  ;;  %v2635_v58 = vrot.slane %v974_v27, %v2410_v30  ;;  %v2643_v62 = vrot.slane %v709_v38, %v2410_v30  ;;  %v363_v9 = vcombine.low %v2425_v40, %v2430_v42 }
 0x132   : > { %v2626_v8 = vrot.slane %v1023_v31, %v2410_v30  ;;  %v332_v1 = vcombine.high %v328_v13, %v2217_v34  ;;  %v744_v61 = vcombine.high %v2488_v29, %v2217_v34  ;;  %v2655_v16 = vrot.slane %v710_v55, %v2410_v30 }
 0x133   : > { %3414 = vst [vmem:[#allocation11_spill] sm:$0xff] %v2635_v58  ;;  %v727_v60 = vcombine.high %v2643_v62, %v2217_v34  ;;  %v729_v18 = vcombine.high %v2390_v10, %v2217_v34  ;;  %v348_v40 = vcombine.high %v2421_v39, %v2217_v34  ;;  %v371_v42 = vrot.slane %v363_v9, %v2410_v30 }
 0x134   : > { %3413 = vst [vmem:[#allocation10_spill] sm:$0xff] %v2626_v8  ;;  %1310 = vrot.lane.b32.xlu1 %v328_v13, %s2237_s23  ;;  %1478 = vrot.lane.b32.xlu0 %v725_v33, %s2238_s21  ;;  %v758_v29 = vrot.slane %v744_v61, %v2406_v25  ;;  %v760_v52 = vcombine.high %v2485_v28, %v2494_v35 }
 0x135   : > { %v728_v23 = vcombine.high %v2655_v16, %v2217_v34  ;;  %v333_v27 = vcombine.high %v2378_v4, %v2217_v34  ;;  %v743_v10 = vrot.slane %v729_v18, %v2406_v25  ;;  %v362_v39 = vrot.slane %v348_v40, %v2406_v25 }
 0x136   : > { %v395_v31 = vcombine.high %v371_v42, %v2217_v34  ;;  %v2677_v28 = vrot.slane %v760_v52, %v2410_v30  ;;  %v396_v4 = vcombine.high %v2442_v48, %v2217_v34  ;;  %v817_v38 = vrot.slane %v2510_v47, %v2406_v25 }
 0x137   : > { %v775_v35 = vcombine.low %v743_v10, %v758_v29  ;;  %v347_v32 = vrot.slane %v333_v27, %v2406_v25  ;;  %v802_v55 = vrot.slane %v2392_v11, %v2406_v25  ;;  %v810_v48 = vcombine.high %v2510_v47, %v2217_v34 }
 0x138   : > { %1306 = vrot.lane.b32.xlu1 %v331_v53, %s3352_s11  ;;  %1486 = vrot.lane.b32.xlu0 %v726_v3, %s3379_s5  ;;  %s3378_s11 = smov 116   ;;  %v776_v53 = vcombine.high %v743_v10, %v758_v29  ;;  %v406_v10 = vrot.slane %v2380_v5, %v2406_v25 }
 0x139   : > { %v379_v13 = vcombine.low %v347_v32, %v362_v39  ;;  %v2688_v33 = vrot.slane %v775_v35, %v2410_v30  ;;  %v380_v9 = vcombine.high %v347_v32, %v362_v39  ;;  %v824_v40 = vrot.slane %v810_v48, %v2406_v25 }
 0x13a   : > { %v2699_v61 = vrot.slane %v776_v53, %v2410_v30  ;;  %v1008_v32 = vcombine.high %v2596_v20, %v2217_v34 }
 0x13b   : > { %v387_v3 = vrot.slane %v379_v13, %v2410_v30  ;;  %v394_v18 = vrot.slane %v380_v9, %v2410_v30  ;;  %v993_v13 = vcombine.high %v2398_v14, %v2217_v34  ;;  %v414_v14 = vcombine.high %v2438_v46, %v2217_v34 }
 0x13c   : > { %1314 = vrot.lane.b32.xlu1 %v332_v1, %s3370_s14  ;;  %1494 = vrot.lane.b32.xlu0 %v727_v60, %s3378_s11  ;;  %v825_v1 = vcombine.low %v802_v55, %v817_v38  ;;  %v795_v60 = vcombine.high %v2392_v11, %v2217_v34  ;;  %v421_v11 = vrot.slane %v2438_v46, %v2406_v25 }
 0x13d   : > { %v397_v52 = vcombine.high %v387_v3, %v2217_v34  ;;  %v1007_v9 = vrot.slane %v993_v13, %v2406_v25 }
 0x13e   : > { %v2709_v47 = vrot.slane %v825_v1, %v2410_v30  ;;  %v809_v29 = vrot.slane %v795_v60, %v2406_v25  ;;  %v429_v39 = vcombine.low %v406_v10, %v421_v11  ;;  %v198_v60 = vpop.trf.xlu0 }
 0x140   : > { %1318 = vrot.lane.b32.xlu1 %v371_v42, %s2241_s4  ;;  %1502 = vrot.lane.b32.xlu0 %v728_v23, %s3376_s28  ;;  %v826_v42 = vcombine.high %v802_v55, %v817_v38  ;;  %v841_v23 = vcombine.low %v809_v29, %v824_v40  ;;  %v842_v35 = vcombine.high %v809_v29, %v824_v40 }
 0x141   : > { %v430_v38 = vcombine.high %v406_v10, %v421_v11  ;;  %v437_v53 = vrot.slane %v429_v39, %v2410_v30  ;;  %v1022_v55 = vrot.slane %v1008_v32, %v2406_v25  ;;  %v1074_v10 = vcombine.high %v198_v60, %v2217_v34 }
 0x142   : > { %v2719_v27 = vrot.slane %v826_v42, %v2410_v30  ;;  %v2742_v20 = vrot.slane %v842_v35, %v2410_v30  ;;  %v1081_v42 = vrot.slane %v198_v60, %v2406_v25  ;;  %v1059_v35 = vcombine.high %v2400_v15, %v2217_v34 }
 0x143   : > { %v444_v48 = vrot.slane %v430_v38, %v2410_v30  ;;  %v461_v46 = vcombine.high %v437_v53, %v2217_v34  ;;  %v1040_v40 = vcombine.high %v1007_v9, %v1022_v55  ;;  %v1088_v13 = vrot.slane %v1074_v10, %v2406_v25 }
 0x144   : > { %1322 = vrot.lane.b32.xlu1 %v395_v31, %s3358_s20  ;;  %1510 = vrot.lane.b32.xlu0 %v2677_v28, %s2218_s17  ;;  %s2243_s20 = smov 80   ;;  %v398_v31 = vcombine.high %v394_v18, %v2217_v34  ;;  %v1132_v10 = vrot.slane %v2402_v19, %v2406_v25 }
 0x148   : > { %1330 = vrot.lane.b32.xlu1 %v396_v4, %s3360_s22  ;;  %1518 = vrot.lane.b32.xlu0 %v2688_v33, %s2222_s29  ;;  %s3362_s22 = smov 88   ;;  %v2730_v4 = vrot.slane %v841_v23, %v2410_v30 }
 0x14c   : > { %1334 = vrot.lane.b32.xlu1 %v387_v3, %s2243_s20  ;;  %1526 = vrot.lane.b32.xlu0 %v2699_v61, %s2223_s3  ;;  %v1024_v3 = vcombine.high %v2578_v49, %v2600_v22  ;;  %v1039_v49 = vcombine.low %v1007_v9, %v1022_v55  ;;  %v399_v22 = vcombine.high %v2380_v5, %v2217_v34 }
 0x14d   : > { %v1066_v5 = vrot.slane %v2400_v15, %v2406_v25  ;;  %v1073_v55 = vrot.slane %v1059_v35, %v2406_v25  ;;  %v487_v15 = vrot.slane %v2447_v50, %v2406_v25 }
 0x14e   : > { %v2752_v1 = vrot.slane %v1024_v3, %v2410_v30  ;;  %v2763_v29 = vrot.slane %v1039_v49, %v2410_v30  ;;  %v413_v11 = vrot.slane %v399_v22, %v2406_v25  ;;  %v472_v49 = vrot.slane %v2382_v6, %v2406_v25 }
 0x14f   : > { %v1089_v39 = vcombine.low %v1066_v5, %v1081_v42  ;;  %v1090_v38 = vcombine.high %v1066_v5, %v1081_v42 }
 0x150   : > { %1342 = vrot.lane.b32.xlu1 %v394_v18, %s3362_s22  ;;  %1534 = vrot.lane.b32.xlu0 %v2709_v47, %s2227_s13  ;;  %s2245_s22 = smov 96   ;;  %v428_v18 = vrot.slane %v414_v14, %v2406_v25  ;;  %v495_v22 = vcombine.low %v472_v49, %v487_v15  ;;  %v496_v35 = vcombine.high %v472_v49, %v487_v15 }
 0x151   : > { %v2794_v14 = vrot.slane %v1090_v38, %v2410_v30 }
 0x152   : > { %v445_v23 = vcombine.low %v413_v11, %v428_v18  ;;  %v446_v9 = vcombine.high %v413_v11, %v428_v18  ;;  %v199_v18 = vpop.trf.xlu0  ;;  %v2812_v5 = vrot.slane %v495_v22, %v2410_v30 }
 0x154   : > { %1338 = vrot.lane.b32.xlu1 %v397_v52, %s3375_s30  ;;  %1542 = vrot.lane.b32.xlu0 %v2719_v27, %s2229_s16  ;;  %v462_v52 = vcombine.high %v444_v48, %v2217_v34  ;;  %v453_v32 = vrot.slane %v445_v23, %v2410_v30  ;;  %v460_v60 = vrot.slane %v446_v9, %v2410_v30 }
 0x156   : > { %v463_v3 = vcombine.high %v453_v32, %v2217_v34  ;;  %v464_v11 = vcombine.high %v460_v60, %v2217_v34 }
 0x158   : > { %1346 = vrot.lane.b32.xlu1 %v398_v31, %s3364_s26  ;;  %1550 = vrot.lane.b32.xlu0 %v2730_v4, %s2235_s2  ;;  %s3366_s26 = smov 104   ;;  %v2774_v31 = vrot.slane %v1040_v40, %v2410_v30 }
 0x15c   : > { %1350 = vrot.lane.b32.xlu1 %v437_v53, %s2245_s22  ;;  %1558 = vrot.lane.b32.xlu0 %v2742_v20, %s2237_s23  ;;  %v2784_v53 = vrot.slane %v1089_v39, %v2410_v30  ;;  %v480_v39 = vcombine.high %v2447_v50, %v2217_v34  ;;  %v510_v50 = vrot.slane %v496_v35, %v2410_v30 }
 0x15e   : > { %v494_v9 = vrot.slane %v480_v39, %v2406_v25  ;;  %v1125_v39 = vcombine.high %v2402_v19, %v2217_v34 }
 0x160   : > { %1358 = vrot.lane.b32.xlu1 %v444_v48, %s3366_s26  ;;  %1634 = vrot.lane.b32.xlu0 %v2752_v1, %s2218_s17  ;;  %s3368_s26 = smov 112   ;;  %v1105_v48 = vcombine.low %v1073_v55, %v1088_v13 }
 0x162   : > { %v2803_v40 = vrot.slane %v1105_v48, %v2410_v30 }
 0x164   : > { %1354 = vrot.lane.b32.xlu1 %v461_v46, %s2238_s21  ;;  %1642 = vrot.lane.b32.xlu0 %v2763_v29, %s2222_s29  ;;  %v1106_v46 = vcombine.high %v1073_v55, %v1088_v13  ;;  %v527_v13 = vcombine.high %v2812_v5, %v2217_v34 }
 0x166   : > { %v1120_v23 = vrot.slane %v1106_v46, %v2410_v30  ;;  %v1140_v46 = vcombine.high %v199_v18, %v2217_v34 }
 0x168   : > { %1362 = vrot.lane.b32.xlu1 %v462_v52, %s3379_s5  ;;  %1650 = vrot.lane.b32.xlu0 %v2774_v31, %s2223_s3  ;;  %v1147_v52 = vrot.slane %v199_v18, %v2406_v25  ;;  %v1124_v55 = vcombine.high %v1120_v23, %v2217_v34  ;;  %v1139_v18 = vrot.slane %v1125_v39, %v2406_v25 }
 0x16a   : > { %v1155_v38 = vcombine.low %v1132_v10, %v1147_v52 }
 0x16c   : > { %1366 = vrot.lane.b32.xlu1 %v453_v32, %s3368_s26  ;;  %1658 = vrot.lane.b32.xlu0 %v2784_v53, %s2227_s13  ;;  %s3380_s26 = smov 120   ;;  %v1163_v15 = vrot.slane %v1155_v38, %v2410_v30  ;;  %v1154_v38 = vrot.slane %v1140_v46, %v2406_v25 }
 0x16e   : > { %v1172_v39 = vcombine.high %v1139_v18, %v1154_v38 }
 0x170   : > { %1370 = vrot.lane.b32.xlu1 %v463_v3, %s3378_s11  ;;  %1666 = vrot.lane.b32.xlu0 %v2794_v14, %s2229_s16  ;;  %v465_v3 = vcombine.high %v2382_v6, %v2217_v34  ;;  %v528_v6 = vcombine.high %v510_v50, %v2217_v34 }
 0x172   : > { %v479_v49 = vrot.slane %v465_v3, %v2406_v25  ;;  %v1171_v3 = vcombine.low %v1139_v18, %v1154_v38  ;;  %v1198_v38 = vrot.slane %v2404_v24, %v2406_v25 }
 0x174   : > { %1374 = vrot.lane.b32.xlu1 %v460_v60, %s3380_s26  ;;  %1674 = vrot.lane.b32.xlu0 %v2803_v40, %s2235_s2  ;;  %v511_v60 = vcombine.low %v479_v49, %v494_v9  ;;  %v1179_v46 = vrot.slane %v1171_v3, %v2410_v30 }
 0x176   : > { %v2808_v42 = vpop.permute.xlu1 %1262 }
 0x178   : > { %1378 = vrot.lane.b32.xlu1 %v464_v11, %s3376_s28  ;;  %1682 = vrot.lane.b32.xlu0 %v1120_v23, %s2237_s23  ;;  %v1156_v11 = vcombine.high %v1132_v10, %v1147_v52  ;;  %v1187_v23 = vcombine.high %v1163_v15, %v2217_v34  ;;  %v512_v10 = vcombine.high %v479_v49, %v494_v9  ;;  %s3422_s28 = smov 92  }
 0x17a   : > { %v2822_v32 = vpop.permute.xlu1 %1258 }
 0x17c   : > { %1382 = vrot.lane.b32.xlu1 %v527_v13, %s3373_s25  ;;  %1686 = vrot.lane.b32.xlu0 %v1124_v55, %s3370_s14  ;;  %s3415_s14 = smov 68   ;;  %v519_v13 = vrot.slane %v511_v60, %v2410_v30  ;;  %v1170_v55 = vrot.slane %v1156_v11, %v2410_v30  ;;  %s3418_s25 = smov 76   ;;  %v526_v60 = vrot.slane %v512_v10, %v2410_v30 }
 0x17d   : > { %v538_v11 = vrot.slane %v2384_v7, %v2406_v25  ;;  %v1186_v10 = vrot.slane %v1172_v39, %v2410_v30 }
 0x17e   : > { %v2832_v48 = vpop.permute.xlu1 %1266  ;;  %v529_v19 = vcombine.high %v519_v13, %v2217_v34 }
 0x180   : > { %1386 = vrot.lane.b32.xlu1 %v510_v50, %s2218_s17  ;;  %1690 = vrot.lane.b32.xlu0 %v1163_v15, %s2241_s4  ;;  %s3416_s17 = smov 72   ;;  %v1188_v50 = vcombine.high %v1170_v55, %v2217_v34  ;;  %v553_v15 = vrot.slane %v2453_v54, %v2406_v25  ;;  %v1189_v54 = vcombine.high %v1179_v46, %v2217_v34 }
 0x182   : > { %v2839_v22 = vpop.permute.xlu1 %1270  ;;  %v561_v9 = vcombine.low %v538_v11, %v553_v15  ;;  %v562_v18 = vcombine.high %v538_v11, %v553_v15 }
 0x184   : > { %1390 = vrot.lane.b32.xlu1 %v528_v6, %s3371_s27  ;;  %1694 = vrot.lane.b32.xlu0 %v1187_v23, %s3415_s14  ;;  %s3417_s27 = smov 20   ;;  %v530_v23 = vcombine.high %v526_v60, %v2217_v34  ;;  %v569_v7 = vrot.slane %v561_v9, %v2410_v30 }
 0x186   : > { %v2848_v35 = vpop.permute.xlu1 %1278 }
 0x188   : > { %1394 = vrot.lane.b32.xlu1 %v519_v13, %s2222_s29  ;;  %1698 = vrot.lane.b32.xlu0 %v1170_v55, %s3416_s17  ;;  %v200_v13 = vpop.trf.xlu0  ;;  %s3419_s29 = smov 28  }
 0x18a   : > { %v2856_v52 = vpop.permute.xlu1 %1274 }
 0x18c   : > { %1398 = vrot.lane.b32.xlu1 %v529_v19, %s3417_s27  ;;  %1702 = vrot.lane.b32.xlu0 %v1188_v50, %s3418_s25  ;;  %v1213_v19 = vrot.slane %v200_v13, %v2406_v25  ;;  %v593_v50 = vcombine.high %v569_v7, %v2217_v34 }
 0x18e   : > { %v2864_v6 = vpop.permute.xlu1 %1282 }
 0x190   : > { %1402 = vrot.lane.b32.xlu1 %v526_v60, %s2223_s3  ;;  %1706 = vrot.lane.b32.xlu0 %v1179_v46, %s2243_s20  ;;  %s3420_s3 = smov 88   ;;  %v1221_v60 = vcombine.low %v1198_v38, %v1213_v19  ;;  %v1190_v46 = vcombine.high %v1186_v10, %v2217_v34 }
 0x192   : > { %v2872_v49 = vpop.permute.xlu1 %1286  ;;  %v1229_v39 = vrot.slane %v1221_v60, %v2410_v30 }
 0x194   : > { %1406 = vrot.lane.b32.xlu1 %v530_v23, %s3419_s29  ;;  %1710 = vrot.lane.b32.xlu0 %v1189_v54, %s3375_s30  ;;  %s3421_s30 = smov 36   ;;  %v576_v23 = vrot.slane %v562_v18, %v2410_v30  ;;  %v1206_v54 = vcombine.high %v200_v13, %v2217_v34  ;;  %v1191_v18 = vcombine.high %v2404_v24, %v2217_v34 }
 0x196   : > { %v2878_v55 = vpop.permute.xlu1 %1294  ;;  %v594_v11 = vcombine.high %v576_v23, %v2217_v34  ;;  %v1220_v60 = vrot.slane %v1206_v54, %v2406_v25  ;;  %v1205_v13 = vrot.slane %v1191_v18, %v2406_v25  ;;  %v1057_v25 = vcombine.high %v2763_v29, %v2217_v34 }
 0x198   : > { %1410 = vrot.lane.b32.xlu1 %v569_v7, %s2227_s13  ;;  %1714 = vrot.lane.b32.xlu0 %v1186_v10, %s3420_s3  ;;  %v1222_v7 = vcombine.high %v1198_v38, %v1213_v19  ;;  %v1253_v10 = vcombine.high %v1229_v39, %v2217_v34  ;;  %s3423_s13 = smov 44   ;;  %v1237_v38 = vcombine.low %v1205_v13, %v1220_v60 }
 0x19a   : > { %v2887_v3 = vpop.permute.xlu1 %1290 }
 0x19c   : > { %1414 = vrot.lane.b32.xlu1 %v593_v50, %s3421_s30  ;;  %1718 = vrot.lane.b32.xlu0 %v1190_v46, %s3422_s28  ;;  %v1236_v46 = vrot.slane %v1222_v7, %v2410_v30 }
 0x19e   : > { %v2893_v9 = vpop.permute.xlu1 %1298  ;;  %v1254_v24 = vcombine.high %v1236_v46, %v2217_v34 }
 0x1a0   : > { %1418 = vrot.lane.b32.xlu1 %v576_v23, %s2229_s16  ;;  %1722 = vrot.lane.b32.xlu0 %v1229_v39, %s2245_s22  ;;  %s3424_s16 = smov 104   ;;  %v1245_v39 = vrot.slane %v1237_v38, %v2410_v30  ;;  %v793_v38 = vcombine.high %v2688_v33, %v2217_v34  ;;  %v858_v33 = vcombine.high %v2719_v27, %v2217_v34 }
 0x1a1   : > { %v1055_v27 = vcombine.high %v2626_v8, %v2217_v34 }
 0x1a2   : > { %v2899_v15 = vpop.permute.xlu1 %1302  ;;  %v1255_v54 = vcombine.high %v1245_v39, %v2217_v34 }
 0x1a4   : > { %1422 = vrot.lane.b32.xlu1 %v594_v11, %s3423_s13  ;;  %1726 = vrot.lane.b32.xlu0 %v1253_v10, %s2238_s21  ;;  %v1238_v11 = vcombine.high %v1205_v13, %v1220_v60  ;;  %v792_v13 = vcombine.high %v2677_v28, %v2217_v34  ;;  %v857_v28 = vcombine.high %v2709_v47, %v2217_v34 }
 0x1a6   : > { %v2908_v50 = vpop.permute.xlu1 %1310  ;;  %v1252_v7 = vrot.slane %v1238_v11, %v2410_v30 }
 0x1a8   : > { %1426 = vrot.lane.b32.xlu1 %v2469_v2, %s2235_s2  ;;  %1730 = vrot.lane.b32.xlu0 %v1236_v46, %s3424_s16  ;;  %s3425_s2 = smov 112   ;;  %v1256_v10 = vcombine.high %v1252_v7, %v2217_v34  ;;  %v791_v46 = vcombine.high %v2515_v51, %v2217_v34 }
 0x1aa   : > { %v2916_v19 = vpop.permute.xlu1 %1306 }
 0x1ac   : > { %1434 = vrot.lane.b32.xlu1 %v2478_v26, %s2237_s23  ;;  %1734 = vrot.lane.b32.xlu0 %v1254_v24, %s3379_s5  ;;  %s3426_s23 = smov 124   ;;  %s3428_s5 = smov 12  }
 0x1ae   : > { %v2922_v23 = vpop.permute.xlu1 %1314 }
 0x1b0   : > { %1442 = vrot.lane.b32.xlu1 %v2501_v43, %s2241_s4  ;;  %1738 = vrot.lane.b32.xlu0 %v1245_v39, %s3425_s2  ;;  %v794_v39 = vcombine.high %v2699_v61, %v2217_v34  ;;  %v859_v61 = vcombine.high %v2730_v4, %v2217_v34 }
 0x1b2   : > { %v2928_v2 = vpop.permute.xlu1 %1318 }
 0x1b4   : > { %1450 = vrot.lane.b32.xlu1 %v2524_v56, %s3416_s17  ;;  %1742 = vrot.lane.b32.xlu0 %v1255_v54, %s3378_s11  ;;  %s3427_s11 = smov 4  }
 0x1b6   : > { %v2934_v26 = vpop.permute.xlu1 %1322 }
 0x1b8   : > { %1458 = vrot.lane.b32.xlu1 %v2555_v21, %s2243_s20  ;;  %1746 = vrot.lane.b32.xlu0 %v1252_v7, %s3380_s26  ;;  %v2954_v21 = vpop.permute.xlu0 %1326 }
 0x1ba   : > { %v2940_v43 = vpop.permute.xlu1 %1330 }
 0x1bc   : > { %1466 = vrot.lane.b32.xlu1 %v2568_v17, %s3420_s3  ;;  %1750 = vrot.lane.b32.xlu0 %v1256_v10, %s3426_s23  ;;  %v2960_v17 = vpop.permute.xlu0 %1430 }
 0x1be   : > { %v2946_v56 = vpop.permute.xlu1 %1334 }
 0x1c0   : > { %1474 = vrot.lane.b32.xlu1 %v2605_v57, %s2245_s22 }
 0x1c2   : > { %v2950_v30 = vpop.permute.xlu1 %1342 }
 0x1c4   : > { %1482 = vrot.lane.b32.xlu1 %v2632_v45, %s3424_s16  ;;  %v2970_v45 = vpop.permute.xlu0 %1438 }
 0x1c6   : > { %v2956_v18 = vpop.permute.xlu1 %1338 }
 0x1c8   : > { %1490 = vrot.lane.b32.xlu1 %v2643_v62, %s3425_s2 }
 0x1ca   : > { %v2962_v60 = vpop.permute.xlu1 %1346 }
 0x1cc   : > { %1498 = vrot.lane.b32.xlu1 %v2655_v16, %s3380_s26  ;;  %v2980_v16 = vpop.permute.xlu0 %1446  ;;  %s3430_s26 = smov 52  }
 0x1ce   : > { %v2966_v57 = vpop.permute.xlu1 %1350 }
 0x1d0   : > { %1506 = vrot.lane.b32.xlu1 %v791_v46, %s3427_s11  ;;  %v2989_v54 = vpop.permute.xlu0 %1454 }
 0x1d2   : > { %v2975_v62 = vpop.permute.xlu1 %1358 }
 0x1d4   : > { %1514 = vrot.lane.b32.xlu1 %v792_v13, %s3428_s5  ;;  %v2999_v10 = vpop.permute.xlu0 %1462 }
 0x1d6   : > { %v2982_v24 = vpop.permute.xlu1 %1354 }
 0x1d8   : > { %1522 = vrot.lane.b32.xlu1 %v793_v38, %s3417_s27  ;;  %v3008_v38 = vpop.permute.xlu0 %1470 }
 0x1da   : > { %v2987_v11 = vpop.permute.xlu1 %1362 }
 0x1dc   : > { %1530 = vrot.lane.b32.xlu1 %v794_v39, %s3419_s29  ;;  %v3016_v39 = vpop.permute.xlu0 %1478 }
 0x1de   : > { %v2994_v7 = vpop.permute.xlu1 %1366 }
 0x1e0   : > { %1538 = vrot.lane.b32.xlu1 %v857_v28, %s3421_s30 }
 0x1e2   : > { %v3001_v46 = vpop.permute.xlu1 %1370 }
 0x1e4   : > { %1546 = vrot.lane.b32.xlu1 %v858_v33, %s3423_s13  ;;  %v1056_v33 = vcombine.high %v2752_v1, %v2217_v34 }
 0x1e6   : > { %v3006_v13 = vpop.permute.xlu1 %1374 }
 0x1e7   : > { %3429 = vst [vmem:[#allocation12_spill] sm:$0xff] %v3006_v13 }
 0x1e8   : > { %1554 = vrot.lane.b32.xlu1 %v859_v61, %s3430_s26  ;;  %v3023_v61 = vpop.permute.xlu0 %1486 }
 0x1ea   : > { %v3011_v47 = vpop.permute.xlu1 %1378 }
 0x1eb   : > { %3431 = vst [vmem:[#allocation13_spill] sm:$0xff] %v3011_v47  ;;  %v1122_v47 = vcombine.high %v2794_v14, %v2217_v34 }
 0x1ec   : > { %1630 = vrot.lane.b32.xlu1 %v1055_v27, %s3427_s11  ;;  %v1058_v27 = vcombine.high %v2774_v31, %v2217_v34  ;;  %v3029_v8 = vpop.permute.xlu0 %1494  ;;  %s3480_s11 = sshll.u32 %s2366_s24, 3 }
 0x1ee   : > { %v1383_v28 = vpop.permute.xlu1 %1382 }
 0x1ef   : > { %v1815_v29 = vsel %vm1753_vm0, %v2812_v5, %v1383_v28  ;;  %v1123_v28 = vcombine.high %v2803_v40, %v2217_v34 }
 0x1f0   : > { %1638 = vrot.lane.b32.xlu1 %v1056_v33, %s3428_s5  ;;  %v1121_v33 = vcombine.high %v2784_v53, %v2217_v34  ;;  %v3042_v13 = vpop.permute.xlu0 %1502  ;;  %s2029_s5 = sshll.u32 %s2281_s10, 7  ;;  %s1932_s10 = scalar_lea.sflag [#allocation4], %s2366_s24 }
 0x1f2   : > { %v1387_v4 = vpop.permute.xlu1 %1386 }
 0x1f4   : > { %1646 = vrot.lane.b32.xlu1 %v1057_v25, %s3417_s27  ;;  %v1816_v25 = vsel %vm1755_vm1, %v1815_v29, %v1387_v4  ;;  %v3049_v4 = vpop.permute.xlu0 %1510  ;;  %s3432_s27 = smov 60  }
 0x1f6   : > { %v1391_v58 = vpop.permute.xlu1 %1390 }
 0x1f7   : > { %v1817_v31 = vsel %vm1757_vm2, %v1816_v25, %v1391_v58  ;;  %v923_v25 = vcombine.high %v2571_v41, %v2217_v34 }
 0x1f8   : > { %1654 = vrot.lane.b32.xlu1 %v1058_v27, %s3419_s29  ;;  %v3056_v40 = vpop.permute.xlu0 %1518  ;;  %s2249_s29 = smov [#allocation5]  }
 0x1fa   : > { %v1395_v1 = vpop.permute.xlu1 %1394 }
 0x1fb   : > { %v1818_v27 = vsel %vm1759_vm3, %v1817_v31, %v1395_v1 }
 0x1fc   : > { %1662 = vrot.lane.b32.xlu1 %v1121_v33, %s3421_s30  ;;  %v3064_v31 = vpop.permute.xlu0 %1526  ;;  %s3298_s30 = scalar_lea.hbm %s3343_s1, %s2029_s5 }
 0x1fe   : > { %v1399_v51 = vpop.permute.xlu1 %1398 }
 0x1ff   : > { %v1819_v53 = vsel %vm1761_vm4, %v1818_v27, %v1399_v51  ;;  %v860_v51 = vcombine.high %v2742_v20, %v2217_v34 }
 0x200   : > { %1670 = vrot.lane.b32.xlu1 %v1122_v47, %s3423_s13 }
 0x202   : > { %v1403_v5 = vpop.permute.xlu1 %1402 }
 0x203   : > { %v1820_v58 = vsel %vm1763_vm5, %v1819_v53, %v1403_v5  ;;  %v1754_v5 = vsel %vm1753_vm0, %v2417_v37, %v2822_v32 }
 0x204   : > { %1678 = vrot.lane.b32.xlu1 %v1123_v28, %s3430_s26  ;;  %s3433_s26 = smov 84  }
 0x206   : > { %v1407_v1 = vpop.permute.xlu1 %1406 }
 0x207   : > { %v1821_v14 = vsel %vm1765_vm6, %v1820_v58, %v1407_v1  ;;  %v1756_v58 = vsel %vm1755_vm1, %v1754_v5, %v2808_v42 }
 0x208   : > { %1562 = vrot.lane.b32.xlu1 %v860_v51, %s3432_s27  ;;  %v1758_v51 = vsel %vm1757_vm2, %v1756_v58, %v2832_v48 }
 0x209   : > { %v1760_v37 = vsel %vm1759_vm3, %v1758_v51, %v2839_v22 }
 0x20a   : > { %v1411_v47 = vpop.permute.xlu1 %1410  ;;  %v1762_v32 = vsel %vm1761_vm4, %v1760_v37, %v2856_v52 }
 0x20b   : > { %v1822_v33 = vsel %vm3387_vm7, %v1821_v14, %v1411_v47  ;;  %v3079_v14 = vpop.permute.xlu0 %1534  ;;  %v1764_v42 = vsel %vm1763_vm5, %v1762_v32, %v2848_v35 }
 0x20c   : > { %1566 = vrot.lane.b32.xlu1 %v2571_v41, %s2241_s4  ;;  %v924_v41 = vcombine.high %v2574_v44, %v2217_v34  ;;  %v1766_v48 = vsel %vm1765_vm6, %v1764_v42, %v2864_v6  ;;  %s3439_s4 = smov 120  }
 0x20e   : > { %v1415_v29 = vpop.permute.xlu1 %1414 }
 0x20f   : > { %v1823_v20 = vsel %vm3386_vm8, %v1822_v33, %v1415_v29  ;;  %v3093_v33 = vpop.permute.xlu0 %1542  ;;  %v925_v29 = vcombine.high %v2590_v0, %v2217_v34 }
 0x210   : > { %1570 = vrot.lane.b32.xlu1 %v923_v25, %s3415_s14  ;;  %v1768_v25 = vsel %vm3387_vm7, %v1766_v48, %v2872_v49  ;;  %vm1787_vm7 = vcmask 588800   ;;  %s133_s14 = scalar_lea.vmem [#allocation5], %s3480_s11 }
 0x211   : > { %v1770_v35 = vsel %vm3386_vm8, %v1768_v25, %v2887_v3  ;;  %vm3392_vm8 = vcmask 556032  }
 0x212   : > { %v1419_v27 = vpop.permute.xlu1 %1418 }
 0x213   : > { %v1824_v53 = vsel %vm1771_vm9, %v1823_v20, %v1419_v27 }
 0x214   : > { %1574 = vrot.lane.b32.xlu1 %v2574_v44, %s3416_s17 }
 0x216   : > { %v1423_v28 = vpop.permute.xlu1 %1422 }
 0x217   : > { %v1825_v1 = vsel %vm1773_vm10, %v1824_v53, %v1423_v28  ;;  %v3112_v53 = vpop.permute.xlu0 %1550 }
 0x218   : > { %1578 = vrot.lane.b32.xlu1 %v924_v41, %s3418_s25  ;;  %s3434_s25 = smov 108  }
 0x21a   : > { %v1427_v44 = vpop.permute.xlu1 %1426 }
 0x21b   : > { %v1826_v47 = vsel %vm3388_vm11, %v1825_v1, %v1427_v44 }
 0x21c   : > { %1582 = vrot.lane.b32.xlu1 %v2590_v0, %s2243_s20  ;;  %v1827_v52 = vsel %vm3389_vm12, %v1826_v47, %v2960_v17  ;;  %v1772_v17 = vsel %vm1771_vm9, %v1770_v35, %v2878_v55  ;;  %v991_v35 = vcombine.high %v2623_v36, %v2217_v34  ;;  %s1946_s20 = sshll.u32 %s133_s14, 4  ;;  %s3300_s20 = int_to_ptr.vmem [resolvable:$true] %s1946_s20 }
 0x21d   : > { %v1774_v49 = vsel %vm1773_vm10, %v1772_v17, %v2893_v9  ;;  %v926_v9 = vcombine.high %v2608_v59, %v2217_v34  ;;  %v3436_v17 = vld [vmem:[#allocation13_spill] sm:$0xff]  ;;  %s2143_s17 = scalar_lea.vmem %s3300_s20, 128 }
 0x21e   : > { %v1435_v22 = vpop.permute.xlu1 %1434  ;;  %v1776_v3 = vsel %vm3388_vm11, %v1774_v49, %v2899_v15  ;;  %vm3394_vm11 = vcmask 621568   ;;  %v3438_v49 = vld [vmem:[#allocation9_spill] sm:$0xff]  ;;  %p2144_p6 = scmp.ne.s32.totalorder %s3300_s20, %s2143_s17 }
 0x21f   : > { %v1828_v20 = vsel %vm3390_vm13, %v1827_v52, %v1435_v22 }
 0x220   : > { %1586 = vrot.lane.b32.xlu1 %v925_v29, %s3433_s26  ;;  %v1829_v27 = vsel %vm3391_vm14, %v1828_v20, %v2970_v45  ;;  %v1778_v45 = vsel %vm3389_vm12, %v1776_v3, %v2916_v19  ;;  %vm3398_vm12 = vcmask 654336   ;;  %v3130_v19 = vpop.permute.xlu0 %1558  ;;  %p2145_p12 = pnand %p2144_p6, %p3482_p11 }
 0x221   : > { %v1780_v41 = vsel %vm3390_vm13, %v1778_v45, %v2908_v50  ;;  %vm3395_vm13 = vcmask 687104   ;;  %v3440_v45 = vld [vmem:[#allocation11_spill] sm:$0xff] }
 0x222   : > { %v1443_v6 = vpop.permute.xlu1 %1442  ;;  %v1782_v15 = vsel %vm3391_vm14, %v1780_v41, %v2922_v23  ;;  %vm3397_vm14 = vcmask 719872   ;;  %p2146_p13 = pneg %p2145_p12 }
 0x223   : > { %v1830_v0 = vsel %vm3393_vm15, %v1829_v27, %v1443_v6 }
 0x224   : > { %1590 = vrot.lane.b32.xlu1 %v2608_v59, %s3420_s3  ;;  %v1831_v55 = vsel %vm3392_vm8, %v1830_v0, %v2980_v16  ;;  %v1784_v59 = vsel %vm3393_vm15, %v1782_v15, %v2928_v2  ;;  %v3150_v32 = vpop.permute.xlu0 %1634  ;;  %vm3399_vm15 = vcmask 785408   ;;  %s2147_s3 = sshll.u32 %s2249_s29, 4  ;;  %s2148_s3 = int_to_ptr.vmem [resolvable:$false] %s2147_s3 }
 0x225   : > { %v1786_v51 = vsel %vm3392_vm8, %v1784_v59, %v2934_v26  ;;  %vm3396_vm8 = vcmask 752640   ;;  %s2149_s13 = scalar_lea.vmem %s2148_s3, 256  ;;  %p2150_p4 = scmp.lt.s32.totalorder %s3300_s20, %s2148_s3 }
 0x226   : > { %v1451_v5 = vpop.permute.xlu1 %1450  ;;  %v1788_v2 = vsel %vm1787_vm7, %v1786_v51, %v2954_v21  ;;  %p2151_p10 = scmp.lt.s32.totalorder %s2149_s13, %s2143_s17 }
 0x227   : > { %v1832_v28 = vsel %vm1787_vm7, %v1831_v55, %v1451_v5  ;;  %v1790_v26 = vsel %vm3394_vm11, %v1788_v2, %v2940_v43 }
 0x228   : > { %1594 = vrot.lane.b32.xlu1 %v926_v9, %s3422_s28  ;;  %v1833_v16 = vsel %vm3394_vm11, %v1832_v28, %v2989_v54  ;;  %v989_v54 = vcombine.high %v2611_v63, %v2217_v34  ;;  %v1792_v44 = vsel %vm3398_vm12, %v1790_v26, %v2946_v56  ;;  %vm3400_vm11 = vcmask 818176   ;;  %v3166_v42 = vpop.permute.xlu0 %1642  ;;  %s3437_s28 = smov 116   ;;  %p2152_p1 = por %p2151_p10, %p2150_p4 }
 0x22a   : > { %v1459_v58 = vpop.permute.xlu1 %1458  ;;  %p2153_p3 = pnand %p2152_p1, %p2146_p13 }
 0x22b   : > { %v1834_v1 = vsel %vm3398_vm12, %v1833_v16, %v1459_v58  ;;  %vm3403_vm12 = vcmask 949248  }
 0x22c   : > { %1598 = vrot.lane.b32.xlu1 %v2611_v63, %s2245_s22  ;;  %v1835_v23 = vsel %vm3395_vm13, %v1834_v1, %v2999_v10  ;;  %v1794_v10 = vsel %vm3395_vm13, %v1792_v44, %v2956_v18  ;;  %vm1803_vm13 = vcmask 850944   ;;  %v1651_v25 = vpop.permute.xlu0 %1650 }
 0x22d   : > { %v1796_v43 = vsel %vm3397_vm14, %v1794_v10, %v2950_v30 }
 0x22e   : > { %v1467_v50 = vpop.permute.xlu1 %1466  ;;  %v1798_v56 = vsel %vm3396_vm8, %v1796_v43, %v2962_v60 }
 0x22f   : > { %v1836_v37 = vsel %vm3397_vm14, %v1835_v23, %v1467_v50  ;;  %v1800_v22 = vsel %vm3399_vm15, %v1798_v56, %v2966_v57  ;;  %vm3404_vm14 = vcmask 916480  }
 0x230   : > { %1602 = vrot.lane.b32.xlu1 %v989_v54, %s2238_s21  ;;  %v1837_v21 = vsel %vm3396_vm8, %v1836_v37, %v3008_v38  ;;  %v990_v38 = vcombine.high %v2614_v12, %v2217_v34  ;;  %v1802_v30 = vsel %vm3400_vm11, %v1800_v22, %v2982_v24  ;;  %vm1805_vm8 = vcmask 883712  }
 0x232   : > { %v1475_v63 = vpop.permute.xlu1 %1474 }
 0x233   : > { %v1838_v47 = vsel %vm3399_vm15, %v1837_v21, %v1475_v63  ;;  %vm3402_vm15 = vcmask 982016  }
 0x234   : > { %1606 = vrot.lane.b32.xlu1 %v2614_v12, %s3424_s16  ;;  %v1839_v48 = vsel %vm3400_vm11, %v1838_v47, %v3016_v39  ;;  %v1804_v39 = vsel %vm1803_vm13, %v1802_v30, %v2975_v62  ;;  %vm3401_vm11 = vcmask 1014784  }
 0x235   : > { %v1806_v57 = vsel %vm1805_vm8, %v1804_v39, %v2987_v11  ;;  %v3435_v11 = vld [vmem:[#allocation12_spill] sm:$0xff] }
 0x236   : > { %v1483_v18 = vpop.permute.xlu1 %1482  ;;  %v1808_v24 = vsel %vm3404_vm14, %v1806_v57, %v2994_v7 }
 0x237   : > { %v1840_v52 = vsel %vm1803_vm13, %v1839_v48, %v1483_v18  ;;  %v3445_v18 = vld [vmem:[#allocation10_spill] sm:$0xff] }
 0x238   : > { %1610 = vrot.lane.b32.xlu1 %v990_v38, %s3434_s25  ;;  %v1841_v29 = vsel %vm1805_vm8, %v1840_v52, %v3023_v61  ;;  %v1810_v61 = vsel %vm3403_vm12, %v1808_v24, %v3001_v46  ;;  %v1659_v46 = vpop.permute.xlu0 %1658 }
 0x239   : > { %v1812_v6 = vsel %vm3402_vm15, %v1810_v61, %v3435_v11 }
 0x23a   : > { %v1491_v60 = vpop.permute.xlu1 %1490  ;;  %v3200_v0 = vsel %vm3401_vm11, %v1812_v6, %v3436_v17 }
 0x23b   : > { %v1842_v12 = vsel %vm3404_vm14, %v1841_v29, %v1491_v60  ;;  %vm3444_vm14 = vcmask 424960  }
 0x23c   : > { %1614 = vrot.lane.b32.xlu1 %v2623_v36, %s3425_s2  ;;  %v1843_v62 = vsel %vm3403_vm12, %v1842_v12, %v3029_v8  ;;  %v1667_v28 = vpop.permute.xlu0 %1666  ;;  %vm3443_vm12 = vcmask 392192  }
 0x23e   : > { %v1499_v20 = vpop.permute.xlu1 %1498 }
 0x23f   : > { %v1844_v27 = vsel %vm3402_vm15, %v1843_v62, %v1499_v20  ;;  %vm3442_vm15 = vcmask 293888  }
 0x240   : > { %v3204_v7 = vsel %vm3401_vm11, %v1844_v27, %v3042_v13  ;;  %1618 = vrot.lane.b32.xlu1 %v991_v35, %s3437_s28  ;;  %v992_v13 = vcombine.high %v3440_v45, %v2217_v34  ;;  %v1675_v16 = vpop.permute.xlu0 %1674  ;;  %vm3441_vm11 = vcmask 261120  }
 0x241   : > { %v1912_v8 = vcombine.low %v3200_v0, %v3204_v7 }
 0x242   : > { %v1507_v36 = vpop.permute.xlu1 %1506 }
 0x243   : > { %v1846_v3 = vsel %vm1753_vm0, %v3438_v49, %v1507_v36 }
 0x244   : > { %1622 = vrot.lane.b32.xlu1 %v3440_v45, %s3439_s4  ;;  %v1847_v55 = vsel %vm1755_vm1, %v1846_v3, %v3049_v4  ;;  %v1683_v23 = vpop.permute.xlu0 %1682 }
 0x246   : > { %v1515_v5 = vpop.permute.xlu1 %1514 }
 0x247   : > { %v1848_v9 = vsel %vm1757_vm2, %v1847_v55, %v1515_v5 }
 0x248   : > { %1626 = vrot.lane.b32.xlu1 %v992_v13, %s3426_s23  ;;  %v1849_v15 = vsel %vm1759_vm3, %v1848_v9, %v3056_v40  ;;  %v1687_v37 = vpop.permute.xlu0 %1686 }
 0x24a   : > { %v1523_v41 = vpop.permute.xlu1 %1522 }
 0x24b   : > { %v1850_v58 = vsel %vm1761_vm4, %v1849_v15, %v1523_v41 }
 0x24c   : > { %v1851_v1 = vsel %vm1763_vm5, %v1850_v58, %v3064_v31  ;;  %v1691_v63 = vpop.permute.xlu0 %1690 }
 0x24e   : > { %v1531_v59 = vpop.permute.xlu1 %1530 }
 0x24f   : > { %v1852_v4 = vsel %vm1765_vm6, %v1851_v1, %v1531_v59 }
 0x250   : > { %v1853_v34 = vsel %vm3441_vm11, %v1852_v4, %v3079_v14  ;;  %v1695_v14 = vpop.permute.xlu0 %1694 }
 0x252   : > { %v1539_v51 = vpop.permute.xlu1 %1538 }
 0x253   : > { %v1854_v50 = vsel %vm3442_vm15, %v1853_v34, %v1539_v51 }
 0x254   : > { %v1855_v40 = vsel %vm1771_vm9, %v1854_v50, %v3093_v33  ;;  %v1699_v56 = vpop.permute.xlu0 %1698 }
 0x256   : > { %v1547_v54 = vpop.permute.xlu1 %1546 }
 0x257   : > { %v1856_v2 = vsel %vm1773_vm10, %v1855_v40, %v1547_v54 }
 0x258   : > { %v1857_v31 = vsel %vm3443_vm12, %v1856_v2, %v3112_v53  ;;  %v1703_v52 = vpop.permute.xlu0 %1702 }
 0x25a   : > { %v1555_v26 = vpop.permute.xlu1 %1554 }
 0x25b   : > { %v1858_v44 = vsel %vm3444_vm14, %v1857_v31, %v1555_v26 }
 0x25c   : > { %v1707_v39 = vpop.permute.xlu0 %1706 }
 0x25e   : > { %v1631_v10 = vpop.permute.xlu1 %1630 }
 0x25f   : > { %v1877_v48 = vsel %vm1753_vm0, %v3445_v18, %v1631_v10  ;;  %vm3446_vm0 = vmmov %vm3441_vm11 }
 0x260   : > { %v1878_v38 = vsel %vm1755_vm1, %v1877_v48, %v3150_v32  ;;  %vm3447_vm11 = vmmov %vm3442_vm15  ;;  %v1711_v20 = vpop.permute.xlu0 %1710  ;;  %vm3458_vm15 = vcmask 752640  }
 0x261   : > { %vm3448_vm1 = vmmov %vm3443_vm12  ;;  %vm3456_vm12 = vcmask 687104  }
 0x262   : > { %v1639_v21 = vpop.permute.xlu1 %1638 }
 0x263   : > { %v1879_v22 = vsel %vm1757_vm2, %v1878_v38, %v1639_v21  ;;  %vm3449_vm2 = vmmov %vm3444_vm14  ;;  %vm3457_vm14 = vcmask 719872  }
 0x264   : > { %v1880_v30 = vsel %vm1759_vm3, %v1879_v22, %v3166_v42  ;;  %v1715_v6 = vpop.permute.xlu0 %1714  ;;  %vm3450_vm3 = vcmask 457728  }
 0x266   : > { %v1647_v47 = vpop.permute.xlu1 %1646 }
 0x267   : > { %v1881_v60 = vsel %vm1761_vm4, %v1880_v30, %v1647_v47  ;;  %vm3451_vm4 = vcmask 490496  }
 0x268   : > { %v1882_v12 = vsel %vm1763_vm5, %v1881_v60, %v1651_v25  ;;  %v1719_v49 = vpop.permute.xlu0 %1718  ;;  %vm3452_vm5 = vcmask 523264  }
 0x26a   : > { %v1655_v43 = vpop.permute.xlu1 %1654 }
 0x26b   : > { %v1883_v57 = vsel %vm1765_vm6, %v1882_v12, %v1655_v43  ;;  %vm3453_vm6 = vcmask 556032  }
 0x26c   : > { %v1884_v61 = vsel %vm3446_vm0, %v1883_v57, %v1659_v46  ;;  %v1723_v55 = vpop.permute.xlu0 %1722  ;;  %vm3459_vm0 = vcmask 785408  }
 0x26e   : > { %v1663_v33 = vpop.permute.xlu1 %1662 }
 0x26f   : > { %v1885_v32 = vsel %vm3447_vm11, %v1884_v61, %v1663_v33  ;;  %vm3460_vm11 = vcmask 818176  }
 0x270   : > { %v1886_v35 = vsel %vm1771_vm9, %v1885_v32, %v1667_v28  ;;  %v1727_v41 = vpop.permute.xlu0 %1726  ;;  %vm3454_vm9 = vcmask 621568  }
 0x272   : > { %v1671_v53 = vpop.permute.xlu1 %1670 }
 0x273   : > { %v1887_v11 = vsel %vm1773_vm10, %v1886_v35, %v1671_v53  ;;  %vm3455_vm10 = vcmask 654336  }
 0x274   : > { %v1888_v27 = vsel %vm3448_vm1, %v1887_v11, %v1675_v16  ;;  %v1731_v1 = vpop.permute.xlu0 %1730  ;;  %vm3461_vm1 = vmmov %vm3450_vm3 }
 0x275   : > { %v1859_v31 = vsel %vm3461_vm1, %v1858_v44, %v3130_v19  ;;  %vm3475_vm1 = vcmask 982016  }
 0x276   : > { %v1679_v29 = vpop.permute.xlu1 %1678 }
 0x277   : > { %v1889_v17 = vsel %vm3449_vm2, %v1888_v27, %v1679_v29  ;;  %vm3462_vm2 = vmmov %vm3451_vm4 }
 0x278   : > { %v1890_v36 = vsel %vm3450_vm3, %v1889_v17, %v1683_v23  ;;  %v1735_v50 = vpop.permute.xlu0 %1734  ;;  %vm3463_vm3 = vmmov %vm3452_vm5  ;;  %v3481_v17 = vld [vmem:[#allocation8_spill] sm:$0xff] }
 0x279   : > { %v1891_v46 = vsel %vm3451_vm4, %v1890_v36, %v1687_v37  ;;  %vm3464_vm4 = vmmov %vm3453_vm6 }
 0x27a   : > { %v1563_v24 = vpop.permute.xlu1 %1562  ;;  %v1892_v45 = vsel %vm3452_vm5, %v1891_v46, %v1691_v63  ;;  %vm3465_vm5 = vmmov %vm3454_vm9 }
 0x27b   : > { %v1893_v13 = vsel %vm3453_vm6, %v1892_v45, %v1695_v14  ;;  %v1860_v63 = vsel %vm3462_vm2, %v1859_v31, %v1563_v24  ;;  %vm3466_vm6 = vmmov %vm3455_vm10 }
 0x27c   : > { %v1894_v28 = vsel %vm1787_vm7, %v1893_v13, %v1699_v56  ;;  %v1739_v37 = vpop.permute.xlu0 %1738 }
 0x27d   : > { %v1895_v58 = vsel %vm3454_vm9, %v1894_v28, %v1703_v52  ;;  %vm3467_vm9 = vmmov %vm3456_vm12 }
 0x27e   : > { %v1567_v62 = vpop.permute.xlu1 %1566  ;;  %v1896_v16 = vsel %vm3455_vm10, %v1895_v58, %v1707_v39  ;;  %vm3468_vm10 = vmmov %vm3457_vm14 }
 0x27f   : > { %v1897_v4 = vsel %vm3456_vm12, %v1896_v16, %v1711_v20  ;;  %v1861_v21 = vsel %vm3463_vm3, %v1860_v63, %v1567_v62  ;;  %vm3469_vm12 = vcmask 916480   ;;  %vm3477_vm3 = vmmov %vm3475_vm1 }
 0x280   : > { %v1898_v34 = vsel %vm3457_vm14, %v1897_v4, %v1715_v6  ;;  %v1743_v43 = vpop.permute.xlu0 %1742  ;;  %vm3470_vm14 = vmmov %vm3458_vm15 }
 0x281   : > { %v1899_v54 = vsel %vm3458_vm15, %v1898_v34, %v1719_v49  ;;  %vm3471_vm15 = vmmov %vm3459_vm0 }
 0x282   : > { %v1571_v42 = vpop.permute.xlu1 %1570  ;;  %v1900_v2 = vsel %vm3459_vm0, %v1899_v54, %v1723_v55  ;;  %vm3473_vm0 = vcmask 949248  }
 0x283   : > { %v1901_v26 = vsel %vm3460_vm11, %v1900_v2, %v1727_v41  ;;  %v1862_v47 = vsel %vm3464_vm4, %v1861_v21, %v1571_v42  ;;  %vm3476_vm2 = vmmov %vm3473_vm0  ;;  %vm3478_vm4 = vcmask 1014784  }
 0x284   : > { %v1902_v14 = vsel %vm1803_vm13, %v1901_v26, %v1731_v1  ;;  %v1747_v30 = vpop.permute.xlu0 %1746 }
 0x285   : > { %v1903_v33 = vsel %vm1805_vm8, %v1902_v14, %v1735_v50 }
 0x286   : > { %v1575_v25 = vpop.permute.xlu1 %1574  ;;  %v1904_v52 = vsel %vm3469_vm12, %v1903_v33, %v1739_v37 }
 0x287   : > { %v1863_v56 = vsel %vm1787_vm7, %v1862_v47, %v1575_v25  ;;  %vm3472_vm7 = vmmov %vm3460_vm11  ;;  %v1905_v39 = vsel %vm3473_vm0, %v1904_v52, %v1743_v43  ;;  %v1920_v25 = vrot.slane %v1912_v8, %v3481_v17 }
 0x288   : > { %vm3474_vm11 = vmmov %vm3469_vm12  ;;  %v1906_v32 = vsel %vm3475_vm1, %v1905_v39, %v1747_v30  ;;  %v1751_v62 = vpop.permute.xlu0 %1750 }
 0x28a   : > { %v1579_v3 = vpop.permute.xlu1 %1578 }
 0x28b   : > { %v1864_v48 = vsel %vm3465_vm5, %v1863_v56, %v1579_v3  ;;  %vm3479_vm5 = vmmov %vm3478_vm4 }
 0x28c   : > { %v1907_v6 = vsel %vm3479_vm5, %v1906_v32, %v1751_v62 }
 0x28e   : > { %v1583_v5 = vpop.permute.xlu1 %1582 }
 0x28f   : > { %v1865_v38 = vsel %vm3466_vm6, %v1864_v48, %v1583_v5 }
 0x292   : > { %v1587_v9 = vpop.permute.xlu1 %1586 }
 0x293   : > { %v1866_v19 = vsel %vm3467_vm9, %v1865_v38, %v1587_v9 }
 0x296   : > { %v1591_v15 = vpop.permute.xlu1 %1590 }
 0x297   : > { %v1867_v44 = vsel %vm3468_vm10, %v1866_v19, %v1591_v15 }
 0x29a   : > { %v1595_v59 = vpop.permute.xlu1 %1594 }
 0x29b   : > { %v1868_v53 = vsel %vm3470_vm14, %v1867_v44, %v1595_v59 }
 0x29e   : > { %v1599_v51 = vpop.permute.xlu1 %1598 }
 0x29f   : > { %v1869_v60 = vsel %vm3471_vm15, %v1868_v53, %v1599_v51 }
 0x2a2   : > { %v1603_v23 = vpop.permute.xlu1 %1602 }
 0x2a3   : > { %v1870_v29 = vsel %vm3472_vm7, %v1869_v60, %v1603_v23 }
 0x2a6   : > { %v1607_v40 = vpop.permute.xlu1 %1606 }
 0x2a7   : > { %v1871_v12 = vsel %vm1803_vm13, %v1870_v29, %v1607_v40 }
 0x2aa   : > { %v1611_v10 = vpop.permute.xlu1 %1610 }
 0x2ab   : > { %v1872_v24 = vsel %vm1805_vm8, %v1871_v12, %v1611_v10 }
 0x2ae   : > { %v1615_v18 = vpop.permute.xlu1 %1614 }
 0x2af   : > { %v1873_v61 = vsel %vm3474_vm11, %v1872_v24, %v1615_v18 }
 0x2b2   : > { %v1619_v22 = vpop.permute.xlu1 %1618 }
 0x2b3   : > { %v1874_v20 = vsel %vm3476_vm2, %v1873_v61, %v1619_v22 }
 0x2b6   : > { %v1623_v57 = vpop.permute.xlu1 %1622 }
 0x2b7   : > { %v1875_v35 = vsel %vm3477_vm3, %v1874_v20, %v1623_v57 }
 0x2ba   : > { %v1627_v11 = vpop.permute.xlu1 %1626 }
 0x2bb   : > { %v1876_v42 = vsel %vm3478_vm4, %v1875_v35, %v1627_v11 }
 0x2bc   : > { %v1913_v27 = vcombine.low %v1876_v42, %v1907_v6 }
 0x2be   : > { %v1927_v36 = vrot.slane %v1913_v27, %v3481_v17 }
 0x2c0   : > { %v1928_v49 = vcombine.low %v1920_v25, %v1927_v36 }
 0x2c2   : > { %1930 = vst [vmem:[%s133_s14] sm:$0xff] %v1928_v49 }
 0x2c3   : > { %2156 = shalt.err (!%p2153_p3)
}
 0x2c4   : > { %s2157_s24 = scalar_lea.hbm %s3298_s30, 128  ;;  %s2161_s23 = scalar_lea.hbm %s3343_s1, 256 }
 0x2c5   : > { %p2158_p5 = scmp.ne.s32.totalorder %s3298_s30, %s2157_s24  ;;  %p2162_p9 = scmp.lt.u32.totalorder %s3298_s30, %s3343_s1 }
 0x2c6   : > { %p2163_p0 = scmp.lt.u32.totalorder %s2161_s23, %s2157_s24  ;;  %p2165_p6 = scmp.lt.u32.totalorder %s2157_s24, %s3298_s30 }
 0x2c7   : > { %p2159_p7 = pnand %p2158_p5, %p3482_p11 }
 0x2c8   : > { %p2164_p2 = por %p2163_p0, %p2162_p9 }
 0x2c9   : > { %p2160_p8 = pneg %p2159_p7 }
 0x2ca   : > { %p2166_p12 = por %p2165_p6, %p2164_p2 }
 0x2cc   : > { %p2167_p13 = pnand %p2166_p12, %p2160_p8 }
 0x2ce   : > { %2170 = shalt.err (!%p2167_p13)
}
 0x2cf   : > { %2032 = dma.vmem_to_hbm [thread:$0]  (%p3482_p11), %s3300_s20, 128, %s3298_s30, %s1932_s10  }
 0x2d0 PF: > { %s1958_s25 = sand.u32 1, %s2197_s6   ;;  %p3483_p4 = scmp.ne.s32.totalorder %s3408_s19, 0 }
 0x2d1   : > { %p3484_p10 = scmp.ge.s32.totalorder %s2209_s9, 2  ;;  %s1959_s28 = scalar_lea.sflag [#allocation4], %s1958_s25 }
 0x2d3   : > { %p2039_p1 = pnand %p3484_p10, %p3483_p4 }
 0x2d5   : > { %2192 = dma.done.wait (!%p2039_p1), %s1959_s28, 128  }
 0x2d6   : > { %2194 = vsyncadd (!%p2039_p1), %s1959_s28, 4294967168  ;;  %p14_p3 = scmp.ge.s32.totalorder %s2285_s12, 4   ;;  %s3485_s6 = smov %s2201_s7 }
 0x2d7   : > { %s3486_s7 = smov %s2205_s8  ;;  %s3487_s8 = smov %s2297_s15 }
 0x2d8   : > { %s3488_s9 = smov %s2285_s12  ;;  %16 = sbr.rel (!%p14_p3) target bundleno = 5 (0x5), region = 69 }
 0x2df   :  { %1964 = vsyncpa [#allocation3], 1 }
 0x2e0   :  { %1966 = vsyncpa [#allocation3 + $0x1], 1 }
 0x2e1   :  { %1967 = vsyncpa [#allocation4], 1 }
 0x2e2   :  { %1969 = vsyncpa [#allocation4 + $0x1], 1 }

</bundles_post_ra>
